<compile_context>
chip_gen: v7x
topology: tpu7x:2x2x1
jax: 0.10.0
libtpu: 0.0.40
codegen_flags: <defaults>
</compile_context>

<pallas_src>
import jax
import jax.numpy as jnp
from jax.experimental import pallas as pl
from jax.experimental.pallas import tpu as pltpu


def bitfc_kernel(x_ref, w1_ref, b1_ref, w2_ref, b2_ref, w3_ref, b3_ref, o_ref):
    # ---- Layer 1: cast x to bf16 in-kernel (VPU, hidden under slack), MXU
    #      matmul with f32 accumulation, f32 bias + ReLU epilogue -------------
    x_bf16 = x_ref[...].astype(jnp.bfloat16)                     # (bm, S)
    h1 = jnp.dot(x_bf16, w1_ref[...], preferred_element_type=jnp.float32)
    h1 = jnp.maximum(h1 + b1_ref[...], 0.0)                      # (bm, H) f32

    # ---- Layer 2: activations narrowed to bf16 only as MXU operands ---------
    h2 = jnp.dot(h1.astype(jnp.bfloat16), w2_ref[...],
                 preferred_element_type=jnp.float32)
    h2 = jnp.maximum(h2 + b2_ref[...], 0.0)                      # (bm, H) f32

    # ---- Layer 3 (H -> 1 head): VPU multiply + lane reduction in f32 --------
    logit = jnp.sum(h2 * w3_ref[...], axis=-1, keepdims=True) + b3_ref[...]

    # Direct (bm, 1) writeback: tiny store stream (B*4 bytes) beats a padded
    # lane-dense slab + wrapper slice at this problem size.
    o_ref[...] = logit.astype(o_ref.dtype)


def _pick_bm(B, num_tensorcores=1):
    """Batch tile selection.

    v5e / v6e (1 TensorCore): the grid is a serial loop, so use a single grid
    step (bm == B) up to a generous tile size — extra steps only add fixed
    per-step overhead on a latency-bound kernel.

    v7x (2 TensorCores): keep an even number of grid steps so the "parallel"
    batch axis splits evenly across both cores (an odd count leaves one core
    doing an extra full tile).
    """
    if num_tensorcores <= 1:
        if B <= 512:
            return B
        for cand in (512, 256, 128):
            if B % cand == 0:
                return cand
        return B
    for cand in (256, 128):
        steps = B // cand
        if B % cand == 0 and steps >= num_tensorcores and steps % num_tensorcores == 0:
            return cand
    return B


def prepare_params(w1, b1, w2, b2, w3, b3):
    """One-time parameter prep: keep the MXU weights persistent in bf16 so no
    per-call cast pass is needed.  Biases and the VPU head stay f32."""
    return (w1.astype(jnp.bfloat16), b1,
            w2.astype(jnp.bfloat16), b2,
            w3, b3)


def bitfc_forward(x, w1, b1, w2, b2, w3, b3, *, bm=None, num_tensorcores=1):
    B, S = x.shape
    H = w1.shape[1]
    assert w1.shape == (S, H) and w2.shape == (H, H)
    assert b1.shape == (1, H) and b2.shape == (1, H)
    assert w3.shape == (1, H) and b3.shape == (1, 1)

    if bm is None:
        bm = _pick_bm(B, num_tensorcores)
    # Ragged batches are not handled; pad the batch upstream if needed.
    assert B % bm == 0, "batch must be a multiple of the batch tile"
    # bf16 activations want a sublane-aligned batch tile unless bm == B.
    assert bm == B or bm % 16 == 0

    itemsize = lambda a: a.size * a.dtype.itemsize
    cost = pl.CostEstimate(
        flops=2 * B * (S * H + H * H + H),
        transcendentals=0,
        bytes_accessed=int(itemsize(x) + itemsize(w1) + itemsize(b1)
                           + itemsize(w2) + itemsize(b2) + itemsize(w3)
                           + itemsize(b3) + B * 4),
    )

    grid = (B // bm,)
    out = pl.pallas_call(
        bitfc_kernel,
        out_shape=jax.ShapeDtypeStruct((B, 1), jnp.float32),
        grid=grid,
        in_specs=[
            pl.BlockSpec((bm, S), lambda i: (i, 0)),   # x tile (f32, cast in-kernel)
            # Grid-invariant residents: constant block index -> no re-DMA per
            # step.  At H=128 they total <200 KiB of VMEM on every chip.  If H
            # is ever scaled up, single-buffer them (pipeline_mode=
            # pl.Buffered(1)) and K-tile W2 with a VMEM f32 accumulator +
            # pl.when init/finalize — on v7x (64 MiB physical / 32 MiB scoped
            # VMEM) do this at roughly half the H threshold of v5e/v6e.
            pl.BlockSpec((S, H), lambda i: (0, 0)),    # W1 (bf16, persistent)
            pl.BlockSpec((1, H), lambda i: (0, 0)),    # b1 (f32)
            pl.BlockSpec((H, H), lambda i: (0, 0)),    # W2 (bf16, persistent)
            pl.BlockSpec((1, H), lambda i: (0, 0)),    # b2 (f32)
            pl.BlockSpec((1, H), lambda i: (0, 0)),    # w3 row (f32, VPU head)
            pl.BlockSpec((1, 1), lambda i: (0, 0)),    # b3 (f32)
        ],
        out_specs=pl.BlockSpec((bm, 1), lambda i: (i, 0)),
        compiler_params=pltpu.CompilerParams(
            dimension_semantics=("parallel",),  # shards batch tiles across TCs
        ),
        cost_estimate=cost,
    )(x, w1, b1, w2, b2, w3, b3)

    return out  # (B, 1) logits


def init_params(key, seq_length, hidden_size, dtype=jnp.float32):
    """nn.Linear-style init.  W1/W2 stored transposed to (in, out) for x @ W;
    the final layer's weight stays as a (1, hidden) row (PyTorch (out, in))
    because the kernel applies it on the VPU."""
    ks = jax.random.split(key, 6)

    def lin(kw, kb, fan_in, fan_out, transpose):
        bound = 1.0 / jnp.sqrt(fan_in)
        shape = (fan_in, fan_out) if transpose else (fan_out, fan_in)
        w = jax.random.uniform(kw, shape, dtype, -bound, bound)
        b = jax.random.uniform(kb, (1, fan_out), dtype, -bound, bound)
        return w, b

    w1, b1 = lin(ks[0], ks[1], seq_length, hidden_size, True)
    w2, b2 = lin(ks[2], ks[3], hidden_size, hidden_size, True)
    w3, b3 = lin(ks[4], ks[5], hidden_size, 1, False)   # (1, H) row, (1, 1) bias
    return w1, b1, w2, b2, w3, b3


if __name__ == "__main__":
    seq_length = 256   # module default
    hidden_size = 128  # module default
    batch = 64         # small batch -> bm = B = 64, single grid step

    key = jax.random.PRNGKey(0)
    kx, kp = jax.random.split(key)

    # Synthetic "bit" inputs in {0, 1} (exact in bf16)
    x = jax.random.bernoulli(kx, 0.5, (batch, seq_length)).astype(jnp.float32)
    params_f32 = init_params(kp, seq_length, hidden_size)

    # One-time param prep (persistent bf16 MXU weights).
    params = prepare_params(*params_f32)

    logits = bitfc_forward(x, *params)
    logits = jax.block_until_ready(logits)
    assert logits.shape == (batch, 1)

    # Pure-JAX reference mirroring the kernel's mixed precision
    # (bf16 MXU operands, f32 accumulation and epilogues, f32 VPU head).
    w1, b1, w2, b2, w3, b3 = params_f32
    xb = x.astype(jnp.bfloat16)
    h1 = jnp.maximum(
        jnp.dot(xb, w1.astype(jnp.bfloat16),
                preferred_element_type=jnp.float32) + b1, 0.0)
    h2 = jnp.maximum(
        jnp.dot(h1.astype(jnp.bfloat16), w2.astype(jnp.bfloat16),
                preferred_element_type=jnp.float32) + b2, 0.0)
    ref = jnp.sum(h2 * w3, axis=-1, keepdims=True) + b3

    assert jnp.allclose(logits, ref, atol=1e-3, rtol=1e-3), \
        float(jnp.max(jnp.abs(logits - ref)))

    print("KERNEL_OK")
</pallas_src>

<mosaic_0001>
module attributes {stable_mosaic.version = 11 : i64} {
  func.func @bitfc_kernel(%arg0: i32, %arg1: memref<64x256xf32, #tpu.memory_space<vmem>>, %arg2: memref<256x128xbf16, #tpu.memory_space<vmem>>, %arg3: memref<1x128xf32, #tpu.memory_space<vmem>>, %arg4: memref<128x128xbf16, #tpu.memory_space<vmem>>, %arg5: memref<1x128xf32, #tpu.memory_space<vmem>>, %arg6: memref<1x128xf32, #tpu.memory_space<vmem>>, %arg7: memref<1x1xf32, #tpu.memory_space<vmem>>, %arg8: memref<64x1xf32, #tpu.memory_space<vmem>>) attributes {dimension_semantics = [#tpu.dimension_semantics<parallel>], iteration_bounds = array<i64: 1>, scalar_prefetch = 0 : i64, scratch_operands = 0 : i64, tpu.core_type = #tpu.core_type<tc>, window_params = [{transform_indices = @transform_0, window_bounds = array<i64: 64, 256>}, {pipeline_mode = #tpu.pipeline_mode<synchronous>, transform_indices = @transform_1, window_bounds = array<i64: 256, 128>}, {pipeline_mode = #tpu.pipeline_mode<synchronous>, transform_indices = @transform_2, window_bounds = array<i64: 1, 128>}, {pipeline_mode = #tpu.pipeline_mode<synchronous>, transform_indices = @transform_3, window_bounds = array<i64: 128, 128>}, {pipeline_mode = #tpu.pipeline_mode<synchronous>, transform_indices = @transform_4, window_bounds = array<i64: 1, 128>}, {pipeline_mode = #tpu.pipeline_mode<synchronous>, transform_indices = @transform_5, window_bounds = array<i64: 1, 128>}, {pipeline_mode = #tpu.pipeline_mode<synchronous>, transform_indices = @transform_6, window_bounds = array<i64: 1, 1>}, {transform_indices = @transform_7, window_bounds = array<i64: 64, 1>}]} {
    %c0 = arith.constant 0 : index
    %c0_0 = arith.constant 0 : index
    %0 = vector.load %arg1[%c0, %c0_0] : memref<64x256xf32, #tpu.memory_space<vmem>>, vector<64x256xf32>
    %1 = arith.truncf %0 : vector<64x256xf32> to vector<64x256xbf16>
    %c0_1 = arith.constant 0 : index
    %c0_2 = arith.constant 0 : index
    %2 = vector.load %arg2[%c0_1, %c0_2] : memref<256x128xbf16, #tpu.memory_space<vmem>>, vector<256x128xbf16>
    %cst = arith.constant dense<0.000000e+00> : vector<64x128xf32>
    %3 = tpu.matmul %1, %2, %cst {dimension_numbers = #tpu.dot_dimension_numbers<[1], [0], [0], [1], [0, 0, 1, 1], [], []>} : vector<64x256xbf16>, vector<256x128xbf16>, vector<64x128xf32> -> vector<64x128xf32>
    %c0_3 = arith.constant 0 : index
    %c0_4 = arith.constant 0 : index
    %4 = vector.load %arg3[%c0_3, %c0_4] : memref<1x128xf32, #tpu.memory_space<vmem>>, vector<1x128xf32>
    %5 = vector.broadcast %4 : vector<1x128xf32> to vector<64x128xf32>
    %6 = arith.addf %3, %5 : vector<64x128xf32>
    %cst_5 = arith.constant 0.000000e+00 : f32
    %7 = vector.broadcast %cst_5 : f32 to vector<64x128xf32>
    %8 = arith.maximumf %6, %7 : vector<64x128xf32>
    %9 = arith.truncf %8 : vector<64x128xf32> to vector<64x128xbf16>
    %c0_6 = arith.constant 0 : index
    %c0_7 = arith.constant 0 : index
    %10 = vector.load %arg4[%c0_6, %c0_7] : memref<128x128xbf16, #tpu.memory_space<vmem>>, vector<128x128xbf16>
    %cst_8 = arith.constant dense<0.000000e+00> : vector<64x128xf32>
    %11 = tpu.matmul %9, %10, %cst_8 {dimension_numbers = #tpu.dot_dimension_numbers<[1], [0], [0], [1], [0, 0, 1, 1], [], []>} : vector<64x128xbf16>, vector<128x128xbf16>, vector<64x128xf32> -> vector<64x128xf32>
    %c0_9 = arith.constant 0 : index
    %c0_10 = arith.constant 0 : index
    %12 = vector.load %arg5[%c0_9, %c0_10] : memref<1x128xf32, #tpu.memory_space<vmem>>, vector<1x128xf32>
    %13 = vector.broadcast %12 : vector<1x128xf32> to vector<64x128xf32>
    %14 = arith.addf %11, %13 : vector<64x128xf32>
    %cst_11 = arith.constant 0.000000e+00 : f32
    %15 = vector.broadcast %cst_11 : f32 to vector<64x128xf32>
    %16 = arith.maximumf %14, %15 : vector<64x128xf32>
    %c0_12 = arith.constant 0 : index
    %c0_13 = arith.constant 0 : index
    %17 = vector.load %arg6[%c0_12, %c0_13] : memref<1x128xf32, #tpu.memory_space<vmem>>, vector<1x128xf32>
    %18 = vector.broadcast %17 : vector<1x128xf32> to vector<64x128xf32>
    %19 = arith.mulf %16, %18 : vector<64x128xf32>
    %cst_14 = arith.constant dense<0.000000e+00> : vector<64xf32>
    %20 = vector.multi_reduction <add>, %19, %cst_14 [1] : vector<64x128xf32> to vector<64xf32>
    %21 = vector.shape_cast %20 : vector<64xf32> to vector<64x1xf32>
    %c0_15 = arith.constant 0 : index
    %c0_16 = arith.constant 0 : index
    %22 = vector.load %arg7[%c0_15, %c0_16] : memref<1x1xf32, #tpu.memory_space<vmem>>, vector<1x1xf32>
    %23 = vector.broadcast %22 : vector<1x1xf32> to vector<64x1xf32>
    %24 = arith.addf %21, %23 : vector<64x1xf32>
    %c0_17 = arith.constant 0 : index
    %c0_18 = arith.constant 0 : index
    %25 = vector.load %arg8[%c0_17, %c0_18] : memref<64x1xf32, #tpu.memory_space<vmem>>, vector<64x1xf32>
    tpu.vector_store %arg8[%c0_17, %c0_18], %24 {strides = array<i32>} : memref<64x1xf32, #tpu.memory_space<vmem>>, vector<64x1xf32>,
    return
  }
  func.func @transform_0(%arg0: i32) -> (i32, i32) {
    %c0_i32 = arith.constant 0 : i32
    %c0_i32_0 = arith.constant 0 : i32
    return %arg0, %c0_i32 : i32, i32
  }
  func.func @transform_1(%arg0: i32) -> (i32, i32) {
    %c0_i32 = arith.constant 0 : i32
    %c0_i32_0 = arith.constant 0 : i32
    %c0_i32_1 = arith.constant 0 : i32
    return %c0_i32, %c0_i32_0 : i32, i32
  }
  func.func @transform_2(%arg0: i32) -> (i32, i32) {
    %c0_i32 = arith.constant 0 : i32
    %c0_i32_0 = arith.constant 0 : i32
    %c0_i32_1 = arith.constant 0 : i32
    return %c0_i32, %c0_i32_0 : i32, i32
  }
  func.func @transform_3(%arg0: i32) -> (i32, i32) {
    %c0_i32 = arith.constant 0 : i32
    %c0_i32_0 = arith.constant 0 : i32
    %c0_i32_1 = arith.constant 0 : i32
    return %c0_i32, %c0_i32_0 : i32, i32
  }
  func.func @transform_4(%arg0: i32) -> (i32, i32) {
    %c0_i32 = arith.constant 0 : i32
    %c0_i32_0 = arith.constant 0 : i32
    %c0_i32_1 = arith.constant 0 : i32
    return %c0_i32, %c0_i32_0 : i32, i32
  }
  func.func @transform_5(%arg0: i32) -> (i32, i32) {
    %c0_i32 = arith.constant 0 : i32
    %c0_i32_0 = arith.constant 0 : i32
    %c0_i32_1 = arith.constant 0 : i32
    return %c0_i32, %c0_i32_0 : i32, i32
  }
  func.func @transform_6(%arg0: i32) -> (i32, i32) {
    %c0_i32 = arith.constant 0 : i32
    %c0_i32_0 = arith.constant 0 : i32
    %c0_i32_1 = arith.constant 0 : i32
    return %c0_i32, %c0_i32_0 : i32, i32
  }
  func.func @transform_7(%arg0: i32) -> (i32, i32) {
    %c0_i32 = arith.constant 0 : i32
    %c0_i32_0 = arith.constant 0 : i32
    return %arg0, %c0_i32 : i32, i32
  }
}

</mosaic_0001>

<bundles_post_ra>
// kernel: tpu_custom_call.1
= control target key start
LH: loop header
LB: loop body
LE: loop exit
PB: predicated region body
PF: predicated region fallthrough
CT: control target
= control target key end

     0   :  { %s849_s0 = inlined_call_operand.hbm [shape: f32[64,256], index: 0, kind: input, shape index: {}]   ;;  %s850_s1 = inlined_call_operand.hbm [shape: bf16[256,128], index: 1, kind: input, shape index: {}]   ;;  %s851_s2 = inlined_call_operand.vmem [shape: f32[1,128], index: 2, kind: input, shape index: {}]   ;;  %s852_s3 = inlined_call_operand.hbm [shape: bf16[128,128], index: 3, kind: input, shape index: {}]   ;;  %s853_s4 = inlined_call_operand.vmem [shape: f32[1,128], index: 4, kind: input, shape index: {}]   ;;  %s854_s5 = inlined_call_operand.vmem [shape: f32[1,128], index: 5, kind: input, shape index: {}]   ;;  %s855_s6 = inlined_call_operand.<no memory space> [shape: f32[1,1], index: 6, kind: input, shape index: {}]   ;;  %s856_s7 = inlined_call_operand.vmem [shape: f32[64,1], index: 7, kind: output, shape index: {}]  }
   0x1   :  { %v12_v0 = vstv %s855_s6 }
   0x2   :  { %13 = vst [vmem:[#allocation2] sm:$0x1] %v12_v0 }
   0x3   :  { %14 = vsyncpa [#allocation4], 0 }
   0x4   :  { %15 = vsyncpa [#allocation6], 0  ;;  %s716_s26 = smov [#allocation5]   ;;  %s646_s30 = scalar_lea.hbm %s850_s1, 2048 }
   0x5   :  { %s33_s27 = sshll.u32 %s716_s26, 4  ;;  %p647_p0 = scmp.ne.s32.totalorder %s850_s1, %s646_s30  ;;  %s34_s27 = int_to_ptr.vmem [resolvable:$true] %s33_s27 }
   0x6   :  { %p650_p1 = scmp.lt.u32.totalorder %s646_s30, %s850_s1 }
   0x8   :  { %p652_p2 = pnand %p650_p1, %p647_p0 }
   0xa   :  { %655 = shalt.err (!%p652_p2)
}
   0xb   :  { %s656_s6 = scalar_lea.vmem %s34_s27, 2048  ;;  %p661_p4 = scmp.lt.s32.totalorder %s34_s27, %s34_s27 }
   0xc   :  { %p657_p3 = scmp.ne.s32.totalorder %s34_s27, %s656_s6  ;;  %p662_p5 = scmp.lt.s32.totalorder %s656_s6, %s656_s6 }
   0xe   :  { %p663_p6 = por %p662_p5, %p661_p4 }
  0x10   :  { %p664_p7 = pnand %p663_p6, %p657_p3 }
  0x12   :  { %667 = shalt.err (!%p664_p7)
}
  0x13   :  { %s717_s12 = smov 64   ;;  %s718_s13 = smov 4  }
  0x14   :  { %39 = dma.hbm_to_vmem [thread:$0]  %s850_s1, 2048, %s34_s27, [#allocation6], %s717_s12, %s717_s12, %s718_s13  }
  0x15   :  { %s719_s16 = smov [#allocation3]   ;;  %s668_s20 = scalar_lea.hbm %s849_s0, 2048 }
  0x16   :  { %s21_s17 = sshll.u32 %s719_s16, 4  ;;  %p669_p8 = scmp.ne.s32.totalorder %s849_s0, %s668_s20  ;;  %s22_s17 = int_to_ptr.vmem [resolvable:$true] %s21_s17 }
  0x17   :  { %p672_p9 = scmp.lt.u32.totalorder %s668_s20, %s849_s0 }
  0x19   :  { %p674_p10 = pnand %p672_p9, %p669_p8 }
  0x1b   :  { %677 = shalt.err (!%p674_p10)
}
  0x1c   :  { %s678_s25 = scalar_lea.vmem %s22_s17, 2048  ;;  %p683_p12 = scmp.lt.s32.totalorder %s22_s17, %s22_s17 }
  0x1d   :  { %p679_p11 = scmp.ne.s32.totalorder %s22_s17, %s678_s25  ;;  %p684_p13 = scmp.lt.s32.totalorder %s678_s25, %s678_s25 }
  0x1f   :  { %p685_p0 = por %p684_p13, %p683_p12 }
  0x21   :  { %p686_p1 = pnand %p685_p0, %p679_p11 }
  0x23   :  { %689 = shalt.err (!%p686_p1)
}
  0x24   :  { %s720_s1 = smov 256   ;;  %s721_s26 = smov 16  }
  0x25   :  { %27 = dma.hbm_to_vmem [thread:$0]  %s849_s0, 2048, %s22_s17, [#allocation4], %s720_s1, %s720_s1, %s721_s26  }
  0x26   :  { %s722_s29 = smov [#allocation7]   ;;  %s690_s10 = scalar_lea.hbm %s852_s3, 1024 }
  0x27   :  { %s47_s30 = sshll.u32 %s722_s29, 4  ;;  %p691_p2 = scmp.ne.s32.totalorder %s852_s3, %s690_s10  ;;  %s48_s30 = int_to_ptr.vmem [resolvable:$true] %s47_s30 }
  0x28   :  { %p694_p3 = scmp.lt.u32.totalorder %s690_s10, %s852_s3 }
  0x2a   :  { %p696_p4 = pnand %p694_p3, %p691_p2 }
  0x2c   :  { %699 = shalt.err (!%p696_p4)
}
  0x2d   :  { %s700_s16 = scalar_lea.vmem %s48_s30, 1024  ;;  %p705_p6 = scmp.lt.s32.totalorder %s48_s30, %s48_s30 }
  0x2e   :  { %p701_p5 = scmp.ne.s32.totalorder %s48_s30, %s700_s16  ;;  %p706_p7 = scmp.lt.s32.totalorder %s700_s16, %s700_s16 }
  0x30   :  { %p707_p8 = por %p706_p7, %p705_p6 }
  0x32   :  { %p708_p9 = pnand %p707_p8, %p701_p5 }
  0x34   :  { %711 = shalt.err (!%p708_p9)
}
  0x35   :  { %53 = dma.hbm_to_vmem [thread:$0]  %s852_s3, 1024, %s48_s30, [#allocation6], %s717_s12, %s717_s12, %s718_s13  }
  0x36   :  { %712 = dma.done.wait [#allocation4], 2048  }
  0x37   :  { %713 = vsyncadd [#allocation4], 4294965248 }
  0x38   :  { %714 = dma.done.wait [#allocation6], 3072  }
  0x39   :  { %715 = vsyncadd [#allocation6], 4294964224  ;;  %v622_v1 = vld [vmem:[#allocation5 + $0x40] sm:$0xff]   ;;  %v624_v3 = vld [vmem:[#allocation5 + $0x48] sm:$0xff]   ;;  %vm496_vm0 = vcmask 7168  }
  0x3a   :  { %v623_v2 = vld [vmem:[#allocation5] sm:$0xff]   ;;  %539 = vmatprep.subr.bf16.mxu0 %v622_v1  ;;  %v625_v4 = vld [vmem:[#allocation5 + $0x8] sm:$0xff]   ;;  %v626_v5 = vld [vmem:[#allocation5 + $0x50] sm:$0xff]  }
  0x3b   :  { %540 = vmatpush3.bf16.msra.mxu0 %v623_v2  ;;  %v627_v6 = vld [vmem:[#allocation5 + $0x10] sm:$0xff]   ;;  %v628_v7 = vld [vmem:[#allocation5 + $0x58] sm:$0xff]   ;;  %v630_v9 = vld [vmem:[#allocation5 + $0x60] sm:$0xff]  }
  0x3c   :  { %541 = vmatprep.subr.bf16.mxu0 %v624_v3  ;;  %v629_v8 = vld [vmem:[#allocation5 + $0x18] sm:$0xff]   ;;  %v631_v10 = vld [vmem:[#allocation5 + $0x20] sm:$0xff]   ;;  %v632_v11 = vld [vmem:[#allocation5 + $0x68] sm:$0xff]  }
  0x3d   :  { %v71_v12 = vld [vmem:[#allocation3 + $0x8] sm:$0xff]  ;;  %v73_v13 = vld [vmem:[#allocation3 + $0x18] sm:$0xff]  ;;  %v634_v16 = vld [vmem:[#allocation5 + $0x70] sm:$0xff]  }
  0x3e   :  { %v87_v14 = vpack.c.bf16 %v73_v13, %v71_v12  ;;  %v633_v15 = vld [vmem:[#allocation5 + $0x28] sm:$0xff]   ;;  %v635_v17 = vld [vmem:[#allocation5 + $0x30] sm:$0xff]   ;;  %v636_v18 = vld [vmem:[#allocation5 + $0x78] sm:$0xff]  }
  0x3f   :  { %542 = vmatpush3.bf16.msra.mxu0 %v625_v4  ;;  %v638_v19 = vld [vmem:[#allocation7] sm:$0xff]   ;;  %v639_v20 = vld [vmem:[#allocation7 + $0x8] sm:$0xff]   ;;  %v640_v21 = vld [vmem:[#allocation7 + $0x10] sm:$0xff]  }
  0x40   :  { %543 = vmatprep.subr.bf16.mxu0 %v626_v5  ;;  %261 = vmatprep.mubr.bf16.mxu0 %v87_v14  ;;  %v637_v22 = vld [vmem:[#allocation5 + $0x38] sm:$0xff]   ;;  %v70_v23 = vld [vmem:[#allocation3] sm:$0xff]  ;;  %v72_v24 = vld [vmem:[#allocation3 + $0x10] sm:$0xff] }
  0x41   :  { %591 = vmatprep.subr.bf16.mxu1 %v638_v19  ;;  %v75_v25 = vld [vmem:[#allocation3 + $0x28] sm:$0xff]  ;;  %v77_v26 = vld [vmem:[#allocation3 + $0x38] sm:$0xff]  ;;  %v86_v27 = vpack.c.bf16 %v72_v24, %v70_v23  ;;  %v74_v29 = vld [vmem:[#allocation3 + $0x20] sm:$0xff] }
  0x42   :  { %592 = vmatpush3.bf16.msra.mxu1 %v638_v19  ;;  %v89_v28 = vpack.c.bf16 %v77_v26, %v75_v25  ;;  %v76_v30 = vld [vmem:[#allocation3 + $0x30] sm:$0xff]  ;;  %v79_v31 = vld [vmem:[#allocation3 + $0x48] sm:$0xff]  ;;  %v81_v32 = vld [vmem:[#allocation3 + $0x58] sm:$0xff] }
  0x43   :  { %544 = vmatpush3.bf16.msra.mxu0 %v627_v6  ;;  %593 = vmatprep.subr.bf16.mxu1 %v639_v20  ;;  %v88_v33 = vpack.c.bf16 %v76_v30, %v74_v29  ;;  %v91_v34 = vpack.c.bf16 %v81_v32, %v79_v31  ;;  %v78_v35 = vld [vmem:[#allocation3 + $0x40] sm:$0xff]  ;;  %v80_v36 = vld [vmem:[#allocation3 + $0x50] sm:$0xff]  ;;  %v83_v37 = vld [vmem:[#allocation3 + $0x68] sm:$0xff] }
  0x44   :  { %545 = vmatprep.subr.bf16.mxu0 %v628_v7  ;;  %v85_v38 = vld [vmem:[#allocation3 + $0x78] sm:$0xff]  ;;  %v90_v39 = vpack.c.bf16 %v80_v36, %v78_v35  ;;  %v82_v41 = vld [vmem:[#allocation3 + $0x60] sm:$0xff]  ;;  %v84_v42 = vld [vmem:[#allocation3 + $0x70] sm:$0xff] }
  0x45   :  { %v93_v40 = vpack.c.bf16 %v85_v38, %v83_v37  ;;  %v92_v43 = vpack.c.bf16 %v84_v42, %v82_v41  ;;  %v641_v44 = vld [vmem:[#allocation7 + $0x18] sm:$0xff]   ;;  %v642_v45 = vld [vmem:[#allocation7 + $0x20] sm:$0xff]   ;;  %v643_v46 = vld [vmem:[#allocation7 + $0x28] sm:$0xff]  }
  0x46   :  { %594 = vmatpush3.bf16.msra.mxu1 %v639_v20  ;;  %v644_v47 = vld [vmem:[#allocation7 + $0x30] sm:$0xff]   ;;  %v645_v48 = vld [vmem:[#allocation7 + $0x38] sm:$0xff]  }
  0x47   :  { %546 = vmatpush3.bf16.msra.mxu0 %v629_v8  ;;  %595 = vmatprep.subr.bf16.mxu1 %v640_v21  ;;  %v511_v51 = vld [vmem:[%s851_s2] ss:$0 sm:$0xff] }
  0x48   :  { %547 = vmatprep.subr.bf16.mxu0 %v630_v9  ;;  %v528_v30 = vld [vmem:[%s853_s4] ss:$0 sm:$0xff] }
  0x49   :  { %v537_v36 = vld [vmem:[%s854_s5] ss:$0 sm:$0xff] }
  0x4a   :  { %596 = vmatpush3.bf16.msra.mxu1 %v640_v21 }
  0x4b   :  { %548 = vmatpush3.bf16.msra.mxu0 %v631_v10  ;;  %597 = vmatprep.subr.bf16.mxu1 %v641_v44 }
  0x4c   :  { %549 = vmatprep.subr.bf16.mxu0 %v632_v11 }
  0x4e   :  { %598 = vmatpush3.bf16.msra.mxu1 %v641_v44 }
  0x4f   :  { %550 = vmatpush3.bf16.msra.mxu0 %v633_v15  ;;  %599 = vmatprep.subr.bf16.mxu1 %v642_v45 }
  0x50   :  { %551 = vmatprep.subr.bf16.mxu0 %v634_v16 }
  0x52   :  { %600 = vmatpush3.bf16.msra.mxu1 %v642_v45 }
  0x53   :  { %552 = vmatpush3.bf16.msra.mxu0 %v635_v17  ;;  %601 = vmatprep.subr.bf16.mxu1 %v643_v46 }
  0x54   :  { %553 = vmatprep.subr.bf16.mxu0 %v636_v18 }
  0x56   :  { %602 = vmatpush3.bf16.msra.mxu1 %v643_v46 }
  0x57   :  { %554 = vmatpush3.bf16.msra.mxu0 %v637_v22  ;;  %603 = vmatprep.subr.bf16.mxu1 %v644_v47 }
  0x5a   :  { %262 = vmatmul.mubr.bf16.vlgmr.msra.gmra.mrb[0].mxu0 %v86_v27  ;;  %604 = vmatpush3.bf16.msra.mxu1 %v644_v47 }
  0x5b   :  { %269 = vmatprep.mubr.bf16.mxu0 %v89_v28  ;;  %605 = vmatprep.subr.bf16.mxu1 %v645_v48 }
  0x5e   :  { %606 = vmatpush3.bf16.msra.mxu1 %v645_v48 }
  0x62   :  { %270 = vmatmul.mubr.bf16.gmra.mrb[4].mxu0 %v88_v33 }
  0x63   :  { %277 = vmatprep.mubr.bf16.mxu0 %v91_v34 }
  0x6a   :  { %278 = vmatmul.mubr.bf16.gmra.mrb[8].mxu0 %v90_v39 }
  0x6b   :  { %285 = vmatprep.mubr.bf16.mxu0 %v93_v40 }
  0x72   :  { %286 = vmatmul.mubr.bf16.gmra.mrb[12].mxu0 %v92_v43 }
 0x12d   :  { %v555_v49 = vpop.f32.mrb[0].mxu0 }
 0x12e   :  { %v556_v50 = vpop.f32.mrb[1].mxu0 }
 0x12f   :  { %v557_v52 = vadd.f32 %v556_v50, %v555_v49  ;;  %v558_v53 = vpop.f32.mrb[2].mxu0 }
 0x130   :  { %v559_v54 = vpop.f32.mrb[3].mxu0 }
 0x131   :  { %v560_v55 = vadd.f32 %v559_v54, %v558_v53  ;;  %v264_v56 = vadd.f32 %v557_v52, %v511_v51 }
 0x133   :  { %v267_v57 = vadd.f32 %v560_v55, %v511_v51  ;;  %v294_v59 = vmax.f32 %v264_v56, 0.0 }
 0x135   :  { %v561_v58 = vpop.f32.mrb[4].mxu0  ;;  %v295_v60 = vmax.f32 %v267_v57, 0.0 }
 0x136   :  { %v562_v61 = vpop.f32.mrb[5].mxu0 }
 0x137   :  { %v563_v62 = vadd.f32 %v562_v61, %v561_v58  ;;  %v564_v63 = vpop.f32.mrb[6].mxu0  ;;  %v302_v0 = vpack.c.bf16 %v295_v60, %v294_v59 }
 0x138   :  { %v565_v1 = vpop.f32.mrb[7].mxu0 }
 0x139   :  { %v272_v2 = vadd.f32 %v563_v62, %v511_v51  ;;  %v566_v3 = vadd.f32 %v565_v1, %v564_v63  ;;  %607 = vmatprep.mubr.bf16.mxu1 %v302_v0  ;;  %v538_v0 = vld [vmem:[#allocation2] ss:$0 sm:$0xff] }
 0x13b   :  { %v275_v4 = vadd.f32 %v566_v3, %v511_v51  ;;  %v296_v5 = vmax.f32 %v272_v2, 0.0 }
 0x13d   :  { %v297_v6 = vmax.f32 %v275_v4, 0.0  ;;  %v567_v7 = vpop.f32.mrb[8].mxu0 }
 0x13e   :  { %v568_v8 = vpop.f32.mrb[9].mxu0 }
 0x13f   :  { %v569_v9 = vadd.f32 %v568_v8, %v567_v7  ;;  %v570_v10 = vpop.f32.mrb[10].mxu0  ;;  %v303_v11 = vpack.c.bf16 %v297_v6, %v296_v5 }
 0x140   :  { %v571_v12 = vpop.f32.mrb[11].mxu0 }
 0x141   :  { %v280_v13 = vadd.f32 %v569_v9, %v511_v51  ;;  %v572_v14 = vadd.f32 %v571_v12, %v570_v10  ;;  %608 = vmatmul.mubr.bf16.vlgmr.msra.gmra.mrb[0].mxu1 %v303_v11 }
 0x143   :  { %v283_v15 = vadd.f32 %v572_v14, %v511_v51  ;;  %v298_v16 = vmax.f32 %v280_v13, 0.0 }
 0x145   :  { %v299_v17 = vmax.f32 %v283_v15, 0.0  ;;  %v573_v18 = vpop.f32.mrb[12].mxu0 }
 0x146   :  { %v574_v19 = vpop.f32.mrb[13].mxu0 }
 0x147   :  { %v575_v20 = vadd.f32 %v574_v19, %v573_v18  ;;  %v576_v21 = vpop.f32.mrb[14].mxu0  ;;  %v304_v22 = vpack.c.bf16 %v299_v17, %v298_v16 }
 0x148   :  { %v577_v23 = vpop.f32.mrb[15].mxu0 }
 0x149   :  { %v288_v24 = vadd.f32 %v575_v20, %v511_v51  ;;  %v578_v25 = vadd.f32 %v577_v23, %v576_v21  ;;  %611 = vmatprep.mubr.bf16.mxu1 %v304_v22 }
 0x14b   :  { %v291_v26 = vadd.f32 %v578_v25, %v511_v51  ;;  %v300_v27 = vmax.f32 %v288_v24, 0.0 }
 0x14d   :  { %v301_v28 = vmax.f32 %v291_v26, 0.0 }
 0x14f   :  { %v305_v29 = vpack.c.bf16 %v301_v28, %v300_v27 }
 0x151   :  { %612 = vmatmul.mubr.bf16.gmra.mrb[4].mxu1 %v305_v29 }
 0x214   :  { %v609_v31 = vpop.f32.mrb[0].mxu1 }
 0x215   :  { %v420_v32 = vadd.f32 %v609_v31, %v528_v30  ;;  %v411_v33 = vpop.f32.mrb[1].mxu1 }
 0x216   :  { %v412_v34 = vadd.f32 %v528_v30, %v411_v33  ;;  %v610_v35 = vpop.f32.mrb[2].mxu1 }
 0x217   :  { %v444_v37 = vmax.f32 %v420_v32, 0.0  ;;  %v423_v38 = vadd.f32 %v610_v35, %v528_v30  ;;  %v414_v39 = vpop.f32.mrb[3].mxu1 }
 0x218   :  { %v442_v40 = vmax.f32 %v412_v34, 0.0  ;;  %v415_v41 = vadd.f32 %v528_v30, %v414_v39 }
 0x219   :  { %v445_v42 = vmax.f32 %v423_v38, 0.0  ;;  %v459_v43 = vmul.f32 %v537_v36, %v444_v37 }
 0x21a   :  { %v443_v44 = vmax.f32 %v415_v41, 0.0  ;;  %v457_v45 = vmul.f32 %v537_v36, %v442_v40 }
 0x21b   :  { %469 = vadd.xlane.f32.xlu1 %v459_v43  ;;  %v460_v46 = vmul.f32 %v537_v36, %v445_v42 }
 0x21c   :  { %465 = vadd.xlane.f32.xlu0 %v457_v45  ;;  %v458_v47 = vmul.f32 %v537_v36, %v443_v44 }
 0x21f   :  { %471 = vadd.xlane.f32.xlu1 %v460_v46 }
 0x220   :  { %467 = vadd.xlane.f32.xlu0 %v458_v47 }
 0x224   :  { %v613_v48 = vpop.f32.mrb[4].mxu1 }
 0x225   :  { %v427_v49 = vpop.f32.mrb[5].mxu1  ;;  %v436_v50 = vadd.f32 %v613_v48, %v528_v30 }
 0x226   :  { %v428_v51 = vadd.f32 %v528_v30, %v427_v49  ;;  %v614_v52 = vpop.f32.mrb[6].mxu1 }
 0x227   :  { %v430_v53 = vpop.f32.mrb[7].mxu1  ;;  %v439_v55 = vadd.f32 %v614_v52, %v528_v30  ;;  %v448_v57 = vmax.f32 %v436_v50, 0.0 }
 0x228   :  { %v446_v54 = vmax.f32 %v428_v51, 0.0  ;;  %v431_v56 = vadd.f32 %v528_v30, %v430_v53 }
 0x229   :  { %v449_v60 = vmax.f32 %v439_v55, 0.0  ;;  %v463_v62 = vmul.f32 %v537_v36, %v448_v57 }
 0x22a   :  { %v447_v58 = vmax.f32 %v431_v56, 0.0  ;;  %v461_v59 = vmul.f32 %v537_v36, %v446_v54 }
 0x22b   :  { %v464_v63 = vmul.f32 %v537_v36, %v449_v60 }
 0x22c   :  { %473 = vadd.xlane.f32.xlu0 %v461_v59  ;;  %v462_v61 = vmul.f32 %v537_v36, %v447_v58 }
 0x22e   :  { %475 = vadd.xlane.f32.xlu1 %v462_v61 }
 0x230   :  { %477 = vadd.xlane.f32.xlu0 %v463_v62 }
 0x232   :  { %479 = vadd.xlane.f32.xlu1 %v464_v63 }
 0x2a8   :  { %v470_v1 = vpop.xlane.xlu1 %469 }
 0x2a9   :  { %v490_v2 = vadd.f32 %v538_v0, %v470_v1  ;;  %v466_v3 = vpop.xlane.xlu0 %465 }
 0x2aa   :  { %v488_v4 = vadd.f32 %v538_v0, %v466_v3 }
 0x2ab   :  { %499 = vst.msk [vmem:[%s856_s7 + $0x10] sm:$0xff] %vm496_vm0, %v490_v2 }
 0x2ac   :  { %497 = vst.msk [vmem:[%s856_s7] sm:$0xff] %vm496_vm0, %v488_v4  ;;  %v472_v5 = vpop.xlane.xlu1 %471 }
 0x2ad   :  { %v491_v6 = vadd.f32 %v538_v0, %v472_v5  ;;  %v468_v7 = vpop.xlane.xlu0 %467 }
 0x2ae   :  { %v489_v8 = vadd.f32 %v538_v0, %v468_v7 }
 0x2af   :  { %500 = vst.msk [vmem:[%s856_s7 + $0x18] sm:$0xff] %vm496_vm0, %v491_v6 }
 0x2b0   :  { %498 = vst.msk [vmem:[%s856_s7 + $0x8] sm:$0xff] %vm496_vm0, %v489_v8 }
 0x2b9   :  { %v474_v9 = vpop.xlane.xlu0 %473 }
 0x2ba   :  { %v492_v10 = vadd.f32 %v538_v0, %v474_v9 }
 0x2bb   :  { %v476_v11 = vpop.xlane.xlu1 %475 }
 0x2bc   :  { %501 = vst.msk [vmem:[%s856_s7 + $0x20] sm:$0xff] %vm496_vm0, %v492_v10  ;;  %v493_v12 = vadd.f32 %v538_v0, %v476_v11 }
 0x2bd   :  { %v478_v13 = vpop.xlane.xlu0 %477 }
 0x2be   :  { %502 = vst.msk [vmem:[%s856_s7 + $0x28] sm:$0xff] %vm496_vm0, %v493_v12  ;;  %v494_v14 = vadd.f32 %v538_v0, %v478_v13 }
 0x2bf   :  { %v480_v15 = vpop.xlane.xlu1 %479 }
 0x2c0   :  { %503 = vst.msk [vmem:[%s856_s7 + $0x30] sm:$0xff] %vm496_vm0, %v494_v14  ;;  %v495_v16 = vadd.f32 %v538_v0, %v480_v15 }
 0x2c2   :  { %504 = vst.msk [vmem:[%s856_s7 + $0x38] sm:$0xff] %vm496_vm0, %v495_v16 }
 0x2c3   :  { %509 = vsyncpa [#allocation4], 1 }
 0x2c4   :  { %510 = vsyncpa [#allocation6], 1 }

</bundles_post_ra>
